<compile_context>
chip_gen: v7x
topology: tpu7x:2x2x1
jax: 0.10.0
libtpu: 0.0.40
codegen_flags: <defaults>
</compile_context>

<pallas_src>
import functools

import jax
import jax.numpy as jnp
from jax.experimental import pallas as pl
from jax.experimental.pallas import tpu as pltpu


def _chomp_kernel(x_ref, o_ref):
    lout = o_ref.shape[-1]                 # static
    o_ref[...] = x_ref[:, :lout]           # drop the trailing chomp_size lanes


@functools.partial(jax.jit, static_argnames=("chomp_size", "tile_m"))
def chomp1d(x, chomp_size, tile_m=512):
    """Pallas equivalent of torch Chomp1d: x[:, :, :-chomp_size]."""
    B, C, L = x.shape
    if not 0 < chomp_size < L:
        raise ValueError("chomp_size must be in (0, L)")
    Lout = L - chomp_size

    # Flatten (B, C) -> rows; time stays on the lane axis.
    M = B * C
    x2 = x.reshape(M, L)

    # Row tiling: sublane dim must be a multiple of 8.  Use one big block when
    # the whole problem fits — per-grid-step overhead dominates tiny copies.
    Mp8 = ((M + 7) // 8) * 8
    tm = min(tile_m, Mp8)
    Mp = ((Mp8 + tm - 1) // tm) * tm
    if Mp != M:
        x2 = jnp.pad(x2, ((0, Mp - M), (0, 0)))

    out = pl.pallas_call(
        _chomp_kernel,
        out_shape=jax.ShapeDtypeStruct((Mp, Lout), x.dtype),
        grid=(Mp // tm,),
        in_specs=[pl.BlockSpec((tm, L), lambda i: (i, 0))],
        out_specs=pl.BlockSpec((tm, Lout), lambda i: (i, 0)),
        compiler_params=pltpu.CompilerParams(
            dimension_semantics=("parallel",)),
    )(x2)
    return out[:M].reshape(B, C, Lout)


def reference_chomp1d(x, chomp_size):
    return x[:, :, :-chomp_size]


if __name__ == "__main__":
    # Typical TCN usage: chomp_size = (kernel_size - 1) * dilation; the conv
    # left-pads the sequence and Chomp1d trims it back to the original length.
    B, C, CHOMP = 2, 8, 8
    L = 128 + CHOMP                        # padded length -> Lout = 128 (lane-dense output)
    x = jax.random.normal(jax.random.PRNGKey(0), (B, C, L), jnp.float32)

    out = jax.block_until_ready(chomp1d(x, CHOMP))
    ref = reference_chomp1d(x, CHOMP)

    assert out.shape == (B, C, L - CHOMP)
    assert jnp.array_equal(out, ref), \
        f"max err {float(jnp.max(jnp.abs(out - ref)))}"
    print("KERNEL_OK")
</pallas_src>

<mosaic_0001>
module attributes {stable_mosaic.version = 11 : i64} {
  func.func @_chomp_kernel(%arg0: i32, %arg1: memref<16x136xf32, #tpu.memory_space<vmem>>, %arg2: memref<16x128xf32, #tpu.memory_space<vmem>>) attributes {dimension_semantics = [#tpu.dimension_semantics<parallel>], iteration_bounds = array<i64: 1>, scalar_prefetch = 0 : i64, scratch_operands = 0 : i64, tpu.core_type = #tpu.core_type<tc>, window_params = [{transform_indices = @transform_0, window_bounds = array<i64: 16, 136>}, {transform_indices = @transform_1, window_bounds = array<i64: 16, 128>}]} {
    %c0 = arith.constant 0 : index
    %c0_0 = arith.constant 0 : index
    %0 = vector.load %arg1[%c0, %c0_0] : memref<16x136xf32, #tpu.memory_space<vmem>>, vector<16x128xf32>
    %c0_1 = arith.constant 0 : index
    %c0_2 = arith.constant 0 : index
    %1 = vector.load %arg2[%c0_1, %c0_2] : memref<16x128xf32, #tpu.memory_space<vmem>>, vector<16x128xf32>
    tpu.vector_store %arg2[%c0_1, %c0_2], %0 {strides = array<i32>} : memref<16x128xf32, #tpu.memory_space<vmem>>, vector<16x128xf32>,
    return
  }
  func.func @transform_0(%arg0: i32) -> (i32, i32) {
    %c0_i32 = arith.constant 0 : i32
    %c0_i32_0 = arith.constant 0 : i32
    return %arg0, %c0_i32 : i32, i32
  }
  func.func @transform_1(%arg0: i32) -> (i32, i32) {
    %c0_i32 = arith.constant 0 : i32
    %c0_i32_0 = arith.constant 0 : i32
    return %arg0, %c0_i32 : i32, i32
  }
}

</mosaic_0001>

<bundles_post_ra>
// kernel: chomp1d.1
= control target key start
LH: loop header
LB: loop body
LE: loop exit
PB: predicated region body
PF: predicated region fallthrough
CT: control target
= control target key end

     0   :  { %6 = vsyncpa [#allocation3], 0  ;;  %s138_s0 = inlined_call_operand.hbm [shape: f32[16,136], index: 0, kind: input, shape index: {}]   ;;  %s139_s1 = inlined_call_operand.hbm [shape: f32[16,128], index: 1, kind: output, shape index: {}]  }
   0x1   :  { %7 = vsyncpa [#allocation4], 0  ;;  %s98_s6 = smov [#allocation2]   ;;  %s50_s10 = scalar_lea.hbm %s138_s0, 512 }
   0x2   :  { %s13_s7 = sshll.u32 %s98_s6, 4  ;;  %p51_p0 = scmp.ne.s32.totalorder %s138_s0, %s50_s10  ;;  %s14_s7 = int_to_ptr.vmem [resolvable:$true] %s13_s7 }
   0x3   :  { %p54_p1 = scmp.lt.u32.totalorder %s50_s10, %s138_s0 }
   0x5   :  { %p56_p2 = pnand %p54_p1, %p51_p0 }
   0x7   :  { %59 = shalt.err (!%p56_p2)
}
   0x8   :  { %s60_s15 = scalar_lea.vmem %s14_s7, 512  ;;  %p65_p4 = scmp.lt.s32.totalorder %s14_s7, %s14_s7 }
   0x9   :  { %p61_p3 = scmp.ne.s32.totalorder %s14_s7, %s60_s15  ;;  %p66_p5 = scmp.lt.s32.totalorder %s60_s15, %s60_s15 }
   0xb   :  { %p67_p6 = por %p66_p5, %p65_p4 }
   0xd   :  { %p68_p7 = pnand %p67_p6, %p61_p3 }
   0xf   :  { %71 = shalt.err (!%p68_p7)
}
  0x10   :  { %s99_s16 = smov 256   ;;  %s100_s17 = smov 16  }
  0x11   :  { %19 = dma.hbm_to_vmem [thread:$0]  %s138_s0, 512, %s14_s7, [#allocation3], %s99_s16, %s99_s16, %s100_s17  }
  0x12   :  { %94 = dma.done.wait [#allocation3], 512  }
  0x13   :  { %95 = vsyncadd [#allocation3], 4294966784  ;;  %s101_s20 = smov [#allocation5]   ;;  %v23_v0 = vld [vmem:[#allocation2] sm:$0xff]  ;;  %v24_v1 = vld [vmem:[#allocation2 + $0x10] sm:$0xff] }
  0x14   :  { %s32_s21 = sshll.u32 %s101_s20, 4  ;;  %25 = vst [vmem:[#allocation5] sm:$0xff] %v23_v0  ;;  %26 = vst [vmem:[#allocation5 + $0x8] sm:$0xff] %v24_v1  ;;  %s33_s21 = int_to_ptr.vmem [resolvable:$true] %s32_s21 }
  0x15   :  { %s72_s22 = scalar_lea.vmem %s33_s21, 256  ;;  %p77_p9 = scmp.lt.s32.totalorder %s33_s21, %s33_s21 }
  0x16   :  { %p73_p8 = scmp.ne.s32.totalorder %s33_s21, %s72_s22  ;;  %p78_p10 = scmp.lt.s32.totalorder %s72_s22, %s72_s22 }
  0x18   :  { %p79_p11 = por %p78_p10, %p77_p9 }
  0x1a   :  { %p80_p12 = pnand %p79_p11, %p73_p8 }
  0x1c   :  { %83 = shalt.err (!%p80_p12)
}
  0x1d   :  { %s84_s0 = scalar_lea.hbm %s139_s1, 256 }
  0x1e   :  { %p85_p13 = scmp.ne.s32.totalorder %s139_s1, %s84_s0  ;;  %p88_p0 = scmp.lt.u32.totalorder %s84_s0, %s139_s1 }
  0x20   :  { %p90_p1 = pnand %p88_p0, %p85_p13 }
  0x22   :  { %93 = shalt.err (!%p90_p1)
}
  0x23   :  { %s102_s29 = smov 128   ;;  %s103_s30 = smov 8  }
  0x24   :  { %38 = dma.vmem_to_hbm [thread:$0]  %s33_s21, 256, %s139_s1, [#allocation4], %s102_s29, %s102_s29, %s103_s30  }
  0x25   :  { %96 = dma.done.wait [#allocation4], 256  }
  0x26   :  { %97 = vsyncadd [#allocation4], 4294967040 }
  0x27   :  { %42 = vsyncpa [#allocation3], 1 }
  0x28   :  { %43 = vsyncpa [#allocation4], 1 }

</bundles_post_ra>
